<compile_context>
chip_gen: v6e
topology: v6e:2x2x1
jax: 0.10.0
libtpu: 0.0.40
codegen_flags: <defaults>
</compile_context>

<pallas_src>
import jax
import jax.numpy as jnp
from jax.experimental import pallas as pl
from jax.experimental.pallas import tpu as pltpu

NEG_SLOPE = -10.49165
_MAX_BLOCK_ROWS = 512   # (3+4)*512*128*4B ~= 1.75 MiB per step; x2 buffers ~= 3.5 MiB VMEM


def _conv1x1_leaky_kernel(w_ref, b_ref, x_ref, o_ref):
    """VPU-only 1x1 channel mix + leaky select.

    w_ref: SMEM (Cout, Cin) f32   -- 12 weight scalars
    b_ref: SMEM (Cout,)     f32   -- 4 bias scalars
    x_ref: VMEM (Cin,  R, 128)    -- full (R,128) slab per input channel
    o_ref: VMEM (Cout, R, 128)    -- full (R,128) slab per output channel
    """
    cout, cin = w_ref.shape
    # Hoist the Cin input slabs once; each is a full-vreg (R, 128) block.
    xs = [x_ref[ci] for ci in range(cin)]
    for co in range(cout):
        # Scalar-broadcast FMAs on the VPU; f32 accumulation comes from the
        # f32 SMEM weights/bias (works unchanged for bf16 activations).
        v = xs[0] * w_ref[co, 0]
        for ci in range(1, cin):
            v = v + xs[ci] * w_ref[co, ci]
        v = v + b_ref[co]
        # where(v>0, v, v*slope) == v * where(v>0, 1, slope)
        o_ref[co] = (v * jnp.where(v > 0.0, 1.0, NEG_SLOPE)).astype(o_ref.dtype)


def conv1x1_stride2_leaky(x_nchw, weight, bias):
    """x_nchw: [N, Cin, H, W]; weight: [Cout, Cin, 1, 1]; bias: [Cout]."""
    n, cin, h, w = x_nchw.shape
    cout = weight.shape[0]

    # 1x1 conv, stride 2, padding 0  ==  channel mix over the strided grid.
    # TODO(synk): the stride-2 spatial gather stays as one fused XLA strided
    # slice (an in-kernel lane-strided read is not robustly lowerable); the
    # contiguous reshape to [N, Cin, Ho*Wo] that follows is free, so no
    # transpose pass remains on either the input or the output side.
    xs = x_nchw[:, :, ::2, ::2]                       # [N, Cin, Ho, Wo]
    ho, wo = xs.shape[2], xs.shape[3]
    m = ho * wo                                       # per-image spatial size

    # Lay the per-image spatial axis out as (rows, 128): full (8,128) vregs.
    rows = pl.cdiv(m, 128)
    if rows <= _MAX_BLOCK_ROWS:
        block_rows = rows                  # full dim -> no (8,...) constraint
        rows_pad = rows
    else:
        block_rows = _MAX_BLOCK_ROWS       # multiple of 8
        rows_pad = pl.cdiv(rows, block_rows) * block_rows
    m_pad = rows_pad * 128                 # pad only to 128 mult (+ tail block)

    xf = xs.reshape(n, cin, m)
    if m_pad != m:
        xf = jnp.pad(xf, ((0, 0), (0, 0), (0, m_pad - m)))
    xm = xf.reshape(n, cin, rows_pad, 128)

    wm = weight.reshape(cout, cin).astype(jnp.float32)   # SMEM scalars
    bm = bias.astype(jnp.float32)                        # SMEM scalars

    grid = (n, rows_pad // block_rows)
    out = pl.pallas_call(
        _conv1x1_leaky_kernel,
        out_shape=jax.ShapeDtypeStruct((n, cout, rows_pad, 128), x_nchw.dtype),
        grid=grid,
        in_specs=[
            pl.BlockSpec(memory_space=pltpu.MemorySpace.SMEM),     # weights
            pl.BlockSpec(memory_space=pltpu.MemorySpace.SMEM),     # bias
            pl.BlockSpec((None, cin, block_rows, 128),
                         lambda ni, ri: (ni, 0, ri, 0)),
        ],
        out_specs=pl.BlockSpec((None, cout, block_rows, 128),
                               lambda ni, ri: (ni, 0, ri, 0)),
        compiler_params=pltpu.CompilerParams(
            dimension_semantics=("parallel", "parallel")),
    )(wm, bm, xm)

    out = out.reshape(n, cout, m_pad)
    if m_pad != m:
        out = out[:, :, :m]                # crop the padded tail lanes
    # Already [N, Cout, Ho, Wo] order: reshape only, no output transpose.
    return out.reshape(n, cout, ho, wo)


def reference(x_nchw, weight, bias):
    xs = x_nchw[:, :, ::2, ::2]
    v1 = jnp.einsum("nchw,oc->nohw", xs, weight.reshape(weight.shape[0], -1)) \
        + bias[None, :, None, None]
    return jnp.where(v1 > 0, v1, v1 * NEG_SLOPE)


if __name__ == "__main__":
    key = jax.random.PRNGKey(0)
    kx, kw, kb = jax.random.split(key, 3)

    N, CIN, H, W = 2, 3, 16, 16
    COUT = 4

    x = jax.random.normal(kx, (N, CIN, H, W), dtype=jnp.float32)
    # deterministic Conv2d-style init: U(-bound, bound), bound = 1/sqrt(fan_in)
    fan_in = CIN * 1 * 1
    bound = 1.0 / (fan_in ** 0.5)
    weight = jax.random.uniform(kw, (COUT, CIN, 1, 1), jnp.float32,
                                minval=-bound, maxval=bound)
    bias = jax.random.uniform(kb, (COUT,), jnp.float32,
                              minval=-bound, maxval=bound)

    out = conv1x1_stride2_leaky(x, weight, bias)
    out = jax.block_until_ready(out)

    ref = reference(x, weight, bias)
    assert out.shape == (N, COUT, H // 2, W // 2), out.shape
    assert jnp.allclose(out, ref, atol=1e-5, rtol=1e-5), \
        float(jnp.max(jnp.abs(out - ref)))

    print("KERNEL_OK")
</pallas_src>

<mosaic_0001>
module attributes {stable_mosaic.version = 11 : i64} {
  func.func @_conv1x1_leaky_kernel(%arg0: i32, %arg1: i32, %arg2: memref<4x3xf32, #tpu.memory_space<smem>>, %arg3: memref<4xf32, #tpu.memory_space<smem>>, %arg4: memref<1x3x1x128xf32, #tpu.memory_space<vmem>>, %arg5: memref<1x4x1x128xf32, #tpu.memory_space<vmem>>) attributes {dimension_semantics = [#tpu.dimension_semantics<parallel>, #tpu.dimension_semantics<parallel>], iteration_bounds = array<i64: 2, 1>, scalar_prefetch = 0 : i64, scratch_operands = 0 : i64, tpu.core_type = #tpu.core_type<tc>, window_params = [{transform_indices = @transform_0, window_bounds = array<i64: 4, 3>}, {transform_indices = @transform_1, window_bounds = array<i64: 4>}, {transform_indices = @transform_2, window_bounds = array<i64: 1, 3, 1, 128>}, {transform_indices = @transform_3, window_bounds = array<i64: 1, 4, 1, 128>}]} {
    %c0 = arith.constant 0 : index
    %c0_0 = arith.constant 0 : index
    %c0_1 = arith.constant 0 : index
    %c0_2 = arith.constant 0 : index
    %0 = vector.load %arg4[%c0, %c0_0, %c0_1, %c0_2] : memref<1x3x1x128xf32, #tpu.memory_space<vmem>>, vector<1x1x1x128xf32>
    %1 = vector.shape_cast %0 : vector<1x1x1x128xf32> to vector<1x128xf32>
    %c0_3 = arith.constant 0 : index
    %c1 = arith.constant 1 : index
    %c0_4 = arith.constant 0 : index
    %c0_5 = arith.constant 0 : index
    %2 = vector.load %arg4[%c0_3, %c1, %c0_4, %c0_5] : memref<1x3x1x128xf32, #tpu.memory_space<vmem>>, vector<1x1x1x128xf32>
    %3 = vector.shape_cast %2 : vector<1x1x1x128xf32> to vector<1x128xf32>
    %c0_6 = arith.constant 0 : index
    %c2 = arith.constant 2 : index
    %c0_7 = arith.constant 0 : index
    %c0_8 = arith.constant 0 : index
    %4 = vector.load %arg4[%c0_6, %c2, %c0_7, %c0_8] : memref<1x3x1x128xf32, #tpu.memory_space<vmem>>, vector<1x1x1x128xf32>
    %5 = vector.shape_cast %4 : vector<1x1x1x128xf32> to vector<1x128xf32>
    %c0_9 = arith.constant 0 : index
    %c0_10 = arith.constant 0 : index
    %6 = memref.load %arg2[%c0_9, %c0_10] : memref<4x3xf32, #tpu.memory_space<smem>>
    %7 = vector.broadcast %6 : f32 to vector<1x128xf32>
    %8 = arith.mulf %1, %7 : vector<1x128xf32>
    %c0_11 = arith.constant 0 : index
    %c1_12 = arith.constant 1 : index
    %9 = memref.load %arg2[%c0_11, %c1_12] : memref<4x3xf32, #tpu.memory_space<smem>>
    %10 = vector.broadcast %9 : f32 to vector<1x128xf32>
    %11 = arith.mulf %3, %10 : vector<1x128xf32>
    %12 = arith.addf %8, %11 : vector<1x128xf32>
    %c0_13 = arith.constant 0 : index
    %c2_14 = arith.constant 2 : index
    %13 = memref.load %arg2[%c0_13, %c2_14] : memref<4x3xf32, #tpu.memory_space<smem>>
    %14 = vector.broadcast %13 : f32 to vector<1x128xf32>
    %15 = arith.mulf %5, %14 : vector<1x128xf32>
    %16 = arith.addf %12, %15 : vector<1x128xf32>
    %c0_15 = arith.constant 0 : index
    %17 = memref.load %arg3[%c0_15] : memref<4xf32, #tpu.memory_space<smem>>
    %18 = vector.broadcast %17 : f32 to vector<1x128xf32>
    %19 = arith.addf %16, %18 : vector<1x128xf32>
    %cst = arith.constant 0.000000e+00 : f32
    %20 = vector.broadcast %cst : f32 to vector<1x128xf32>
    %21 = arith.cmpf ogt, %19, %20 : vector<1x128xf32>
    %cst_16 = arith.constant 1.000000e+00 : f32
    %cst_17 = arith.constant -10.4916496 : f32
    %22 = vector.broadcast %cst_16 : f32 to vector<1x128xf32>
    %23 = vector.broadcast %cst_17 : f32 to vector<1x128xf32>
    %24 = arith.select %21, %22, %23 : vector<1x128xi1>, vector<1x128xf32>
    %25 = arith.mulf %19, %24 : vector<1x128xf32>
    %c0_18 = arith.constant 0 : index
    %c0_19 = arith.constant 0 : index
    %c0_20 = arith.constant 0 : index
    %c0_21 = arith.constant 0 : index
    %26 = vector.load %arg5[%c0_18, %c0_19, %c0_20, %c0_21] : memref<1x4x1x128xf32, #tpu.memory_space<vmem>>, vector<1x1x1x128xf32>
    %27 = vector.shape_cast %26 : vector<1x1x1x128xf32> to vector<1x128xf32>
    %28 = vector.shape_cast %25 : vector<1x128xf32> to vector<1x1x1x128xf32>
    tpu.vector_store %arg5[%c0_18, %c0_19, %c0_20, %c0_21], %28 {strides = array<i32>} : memref<1x4x1x128xf32, #tpu.memory_space<vmem>>, vector<1x1x1x128xf32>,
    %c1_22 = arith.constant 1 : index
    %c0_23 = arith.constant 0 : index
    %29 = memref.load %arg2[%c1_22, %c0_23] : memref<4x3xf32, #tpu.memory_space<smem>>
    %30 = vector.broadcast %29 : f32 to vector<1x128xf32>
    %31 = arith.mulf %1, %30 : vector<1x128xf32>
    %c1_24 = arith.constant 1 : index
    %c1_25 = arith.constant 1 : index
    %32 = memref.load %arg2[%c1_24, %c1_25] : memref<4x3xf32, #tpu.memory_space<smem>>
    %33 = vector.broadcast %32 : f32 to vector<1x128xf32>
    %34 = arith.mulf %3, %33 : vector<1x128xf32>
    %35 = arith.addf %31, %34 : vector<1x128xf32>
    %c1_26 = arith.constant 1 : index
    %c2_27 = arith.constant 2 : index
    %36 = memref.load %arg2[%c1_26, %c2_27] : memref<4x3xf32, #tpu.memory_space<smem>>
    %37 = vector.broadcast %36 : f32 to vector<1x128xf32>
    %38 = arith.mulf %5, %37 : vector<1x128xf32>
    %39 = arith.addf %35, %38 : vector<1x128xf32>
    %c1_28 = arith.constant 1 : index
    %40 = memref.load %arg3[%c1_28] : memref<4xf32, #tpu.memory_space<smem>>
    %41 = vector.broadcast %40 : f32 to vector<1x128xf32>
    %42 = arith.addf %39, %41 : vector<1x128xf32>
    %cst_29 = arith.constant 0.000000e+00 : f32
    %43 = vector.broadcast %cst_29 : f32 to vector<1x128xf32>
    %44 = arith.cmpf ogt, %42, %43 : vector<1x128xf32>
    %cst_30 = arith.constant 1.000000e+00 : f32
    %cst_31 = arith.constant -10.4916496 : f32
    %45 = vector.broadcast %cst_30 : f32 to vector<1x128xf32>
    %46 = vector.broadcast %cst_31 : f32 to vector<1x128xf32>
    %47 = arith.select %44, %45, %46 : vector<1x128xi1>, vector<1x128xf32>
    %48 = arith.mulf %42, %47 : vector<1x128xf32>
    %c0_32 = arith.constant 0 : index
    %c1_33 = arith.constant 1 : index
    %c0_34 = arith.constant 0 : index
    %c0_35 = arith.constant 0 : index
    %49 = vector.load %arg5[%c0_32, %c1_33, %c0_34, %c0_35] : memref<1x4x1x128xf32, #tpu.memory_space<vmem>>, vector<1x1x1x128xf32>
    %50 = vector.shape_cast %49 : vector<1x1x1x128xf32> to vector<1x128xf32>
    %51 = vector.shape_cast %48 : vector<1x128xf32> to vector<1x1x1x128xf32>
    tpu.vector_store %arg5[%c0_32, %c1_33, %c0_34, %c0_35], %51 {strides = array<i32>} : memref<1x4x1x128xf32, #tpu.memory_space<vmem>>, vector<1x1x1x128xf32>,
    %c2_36 = arith.constant 2 : index
    %c0_37 = arith.constant 0 : index
    %52 = memref.load %arg2[%c2_36, %c0_37] : memref<4x3xf32, #tpu.memory_space<smem>>
    %53 = vector.broadcast %52 : f32 to vector<1x128xf32>
    %54 = arith.mulf %1, %53 : vector<1x128xf32>
    %c2_38 = arith.constant 2 : index
    %c1_39 = arith.constant 1 : index
    %55 = memref.load %arg2[%c2_38, %c1_39] : memref<4x3xf32, #tpu.memory_space<smem>>
    %56 = vector.broadcast %55 : f32 to vector<1x128xf32>
    %57 = arith.mulf %3, %56 : vector<1x128xf32>
    %58 = arith.addf %54, %57 : vector<1x128xf32>
    %c2_40 = arith.constant 2 : index
    %c2_41 = arith.constant 2 : index
    %59 = memref.load %arg2[%c2_40, %c2_41] : memref<4x3xf32, #tpu.memory_space<smem>>
    %60 = vector.broadcast %59 : f32 to vector<1x128xf32>
    %61 = arith.mulf %5, %60 : vector<1x128xf32>
    %62 = arith.addf %58, %61 : vector<1x128xf32>
    %c2_42 = arith.constant 2 : index
    %63 = memref.load %arg3[%c2_42] : memref<4xf32, #tpu.memory_space<smem>>
    %64 = vector.broadcast %63 : f32 to vector<1x128xf32>
    %65 = arith.addf %62, %64 : vector<1x128xf32>
    %cst_43 = arith.constant 0.000000e+00 : f32
    %66 = vector.broadcast %cst_43 : f32 to vector<1x128xf32>
    %67 = arith.cmpf ogt, %65, %66 : vector<1x128xf32>
    %cst_44 = arith.constant 1.000000e+00 : f32
    %cst_45 = arith.constant -10.4916496 : f32
    %68 = vector.broadcast %cst_44 : f32 to vector<1x128xf32>
    %69 = vector.broadcast %cst_45 : f32 to vector<1x128xf32>
    %70 = arith.select %67, %68, %69 : vector<1x128xi1>, vector<1x128xf32>
    %71 = arith.mulf %65, %70 : vector<1x128xf32>
    %c0_46 = arith.constant 0 : index
    %c2_47 = arith.constant 2 : index
    %c0_48 = arith.constant 0 : index
    %c0_49 = arith.constant 0 : index
    %72 = vector.load %arg5[%c0_46, %c2_47, %c0_48, %c0_49] : memref<1x4x1x128xf32, #tpu.memory_space<vmem>>, vector<1x1x1x128xf32>
    %73 = vector.shape_cast %72 : vector<1x1x1x128xf32> to vector<1x128xf32>
    %74 = vector.shape_cast %71 : vector<1x128xf32> to vector<1x1x1x128xf32>
    tpu.vector_store %arg5[%c0_46, %c2_47, %c0_48, %c0_49], %74 {strides = array<i32>} : memref<1x4x1x128xf32, #tpu.memory_space<vmem>>, vector<1x1x1x128xf32>,
    %c3 = arith.constant 3 : index
    %c0_50 = arith.constant 0 : index
    %75 = memref.load %arg2[%c3, %c0_50] : memref<4x3xf32, #tpu.memory_space<smem>>
    %76 = vector.broadcast %75 : f32 to vector<1x128xf32>
    %77 = arith.mulf %1, %76 : vector<1x128xf32>
    %c3_51 = arith.constant 3 : index
    %c1_52 = arith.constant 1 : index
    %78 = memref.load %arg2[%c3_51, %c1_52] : memref<4x3xf32, #tpu.memory_space<smem>>
    %79 = vector.broadcast %78 : f32 to vector<1x128xf32>
    %80 = arith.mulf %3, %79 : vector<1x128xf32>
    %81 = arith.addf %77, %80 : vector<1x128xf32>
    %c3_53 = arith.constant 3 : index
    %c2_54 = arith.constant 2 : index
    %82 = memref.load %arg2[%c3_53, %c2_54] : memref<4x3xf32, #tpu.memory_space<smem>>
    %83 = vector.broadcast %82 : f32 to vector<1x128xf32>
    %84 = arith.mulf %5, %83 : vector<1x128xf32>
    %85 = arith.addf %81, %84 : vector<1x128xf32>
    %c3_55 = arith.constant 3 : index
    %86 = memref.load %arg3[%c3_55] : memref<4xf32, #tpu.memory_space<smem>>
    %87 = vector.broadcast %86 : f32 to vector<1x128xf32>
    %88 = arith.addf %85, %87 : vector<1x128xf32>
    %cst_56 = arith.constant 0.000000e+00 : f32
    %89 = vector.broadcast %cst_56 : f32 to vector<1x128xf32>
    %90 = arith.cmpf ogt, %88, %89 : vector<1x128xf32>
    %cst_57 = arith.constant 1.000000e+00 : f32
    %cst_58 = arith.constant -10.4916496 : f32
    %91 = vector.broadcast %cst_57 : f32 to vector<1x128xf32>
    %92 = vector.broadcast %cst_58 : f32 to vector<1x128xf32>
    %93 = arith.select %90, %91, %92 : vector<1x128xi1>, vector<1x128xf32>
    %94 = arith.mulf %88, %93 : vector<1x128xf32>
    %c0_59 = arith.constant 0 : index
    %c3_60 = arith.constant 3 : index
    %c0_61 = arith.constant 0 : index
    %c0_62 = arith.constant 0 : index
    %95 = vector.load %arg5[%c0_59, %c3_60, %c0_61, %c0_62] : memref<1x4x1x128xf32, #tpu.memory_space<vmem>>, vector<1x1x1x128xf32>
    %96 = vector.shape_cast %95 : vector<1x1x1x128xf32> to vector<1x128xf32>
    %97 = vector.shape_cast %94 : vector<1x128xf32> to vector<1x1x1x128xf32>
    tpu.vector_store %arg5[%c0_59, %c3_60, %c0_61, %c0_62], %97 {strides = array<i32>} : memref<1x4x1x128xf32, #tpu.memory_space<vmem>>, vector<1x1x1x128xf32>,
    return
  }
  func.func @transform_0(%arg0: i32, %arg1: i32) -> (i32, i32) {
    %c0_i32 = arith.constant 0 : i32
    %c0_i32_0 = arith.constant 0 : i32
    %c0_i32_1 = arith.constant 0 : i32
    return %c0_i32, %c0_i32_0 : i32, i32
  }
  func.func @transform_1(%arg0: i32, %arg1: i32) -> i32 {
    %c0_i32 = arith.constant 0 : i32
    %c0_i32_0 = arith.constant 0 : i32
    return %c0_i32 : i32
  }
  func.func @transform_2(%arg0: i32, %arg1: i32) -> (i32, i32, i32, i32) {
    %c0_i32 = arith.constant 0 : i32
    %c0_i32_0 = arith.constant 0 : i32
    %c0_i32_1 = arith.constant 0 : i32
    return %arg0, %c0_i32, %arg1, %c0_i32_0 : i32, i32, i32, i32
  }
  func.func @transform_3(%arg0: i32, %arg1: i32) -> (i32, i32, i32, i32) {
    %c0_i32 = arith.constant 0 : i32
    %c0_i32_0 = arith.constant 0 : i32
    %c0_i32_1 = arith.constant 0 : i32
    return %arg0, %c0_i32, %arg1, %c0_i32_0 : i32, i32, i32, i32
  }
}

</mosaic_0001>

<bundles_post_ra>
// kernel: tpu_custom_call.1
= control target key start
LH: loop header
LB: loop body
LE: loop exit
PB: predicated region body
PF: predicated region fallthrough
CT: control target
= control target key end

     0   :  { %s928_s0 = inlined_call_operand.hbm [shape: f32[4,3], index: 0, kind: input, shape index: {}]   ;;  %s929_s1 = inlined_call_operand.vmem [shape: f32[4], index: 1, kind: input, shape index: {}]   ;;  %s930_s2 = inlined_call_operand.hbm [shape: f32[2,3,1,128], index: 2, kind: input, shape index: {}]   ;;  %s931_s3 = inlined_call_operand.hbm [shape: f32[2,4,1,128], index: 3, kind: output, shape index: {}]  }
   0x1   :  { %933 = sst [smem:[#allocation14_spill]] %s928_s0 }
   0x2   :  { %8 = vsyncpa [#allocation5], 0 }
   0x3   :  { %9 = vsyncpa [#allocation6], 0 }
   0x4   :  { %10 = vsyncpa [#allocation3], 0 }
   0x5   :  { %12 = vsyncpa [#allocation3 + $0x1], 0 }
   0x6   :  { %13 = vsyncpa [#allocation4], 0 }
   0x7   :  { %15 = vsyncpa [#allocation4 + $0x1], 0  ;;  %s735_s12 = smov 0   ;;  %s737_s13 = smov 0  }
   0x8   :  { %s739_s14 = smov 0   ;;  %s741_s15 = smov 0  }
   0x9   :  { %s743_s16 = smov 0   ;;  %s745_s17 = smov 0  }
   0xa LB: > { %s435_s18 = sadd.s32 4294967295, %s704_s17   ;;  %s436_s19 = sadd.s32 4294967294, %s704_s17   ;;  %s704_s17 = sphi %s745_s17, %s21_s17   ;;  %s700_s16 = sphi %s743_s16, %s949_s16   ;;  %s696_s15 = sphi %s741_s15, %s948_s15   ;;  %s692_s14 = sphi %s739_s14, %s947_s14   ;;  %s688_s13 = sphi %s737_s13, %s946_s13   ;;  %s684_s12 = sphi %s735_s12, %s945_s12  }
   0xb   : > { %s84_s20 = sadd.s32 1, %s692_s14  ;;  %p91_p0 = scmp.ne.s32.totalorder %s692_s14, %s688_s13 }
   0xc   : > { %p92_p1 = scmp.eq.s32.totalorder %s704_s17, 0  ;;  %p97_p2 = scmp.ne.s32.totalorder %s688_s13, %s684_s12 }
   0xd   : > { %p773_p3 = scmp.eq.s32.totalorder %s435_s18, 0  ;;  %p123_p4 = scmp.eq.s32.totalorder %s435_s18, 1 }
   0xe   : > { %p93_p5 = por %p92_p1, %p91_p0  ;;  %p129_p6 = scmp.eq.s32.totalorder %s436_s19, 1 }
   0xf   : > { %p779_p7 = por %p773_p3, %p97_p2  ;;  %p783_p8 = por %p123_p4, %p91_p0 }
  0x10   : > { %p787_p9 = por %p129_p6, %p97_p2  ;;  %p437_p10 = scmp.ge.s32.totalorder %s704_s17, 1 }
  0x11   : > { %s936_s23 = scalar_select %p783_p8, 1, 0 }
  0x12   : > { %s937_s24 = scalar_select %p787_p9, 1, 0 }
  0x13   : > { %p136_p11 = scmp.lt.s32.totalorder %s704_s17, 3  ;;  %p503_p1 = scmp.lt.s32.totalorder %s704_s17, 2 }
  0x14   : > { %s158_s28 = sshll.u32 %s929_s1, 4  ;;  %s169_s4 = sand.u32 1, %s692_s14   ;;  %s159_s28 = int_to_ptr.vmem [resolvable:$true] %s158_s28 }
  0x15   : > { %p794_p13 = pnand %p437_p10, %p136_p11  ;;  %p804_p4 = pnand %p503_p1, %p93_p5 }
  0x16   : > { %s33_s5 = sadd.s32 1, %s700_s16  ;;  %s706_s6 = smov [#allocation2]  }
  0x17   : > { %p486_p0 = pneg %p794_p13  ;;  %s941_s0 = sld [smem:[#allocation14_spill]] }
  0x18   : > { %s573_s9 = scalar_lea.vmem %s159_s28, 16  ;;  %p581_p1 = scmp.lt.s32.totalorder %s159_s28, %s159_s28 }
  0x19   : > { %p810_p2 = pnand %p486_p0, %p773_p3  ;;  %p574_p5 = scmp.ne.s32.totalorder %s159_s28, %s573_s9 }
  0x1a   : > { %p582_p0 = scmp.lt.s32.totalorder %s573_s9, %s573_s9 }
  0x1b   : > { %p575_p6 = pneg %p810_p2 }
  0x1c   : > { %p583_p12 = por %p582_p0, %p581_p1 }
  0x1d   : > { %489 = dma.hbm_to_smem (!%p810_p2), %s941_s0, 64, %s706_s6, [#allocation5]  }
  0x1e   : > { %p576_p10 = pnand %p575_p6, %p574_p5 }
  0x20   : > { %p577_p11 = pneg %p576_p10 }
  0x22   : > { %p584_p9 = pnand %p583_p12, %p577_p11 }
  0x24   : > { %587 = shalt.err (!%p584_p9)
}
  0x25   : > { %s707_s10 = smov [#allocation7]   ;;  %p35_p8 = scmp.ge.s32.totalorder %s33_s5, 2 }
  0x26   : > { %492 = dma.vmem_to_smem (!%p810_p2), %s159_s28, 16, %s707_s10, [#allocation6]  }
  0x27   : > { %s471_s11 = smul.u32 3, %s169_s4  ;;  %s951_s5 = smov (%p35_p8, %s33_s5), 0 }
  0x28   : > { %s472_s18 = smul.u32 48, %s700_s16  ;;  %s79_s19 = ssub.s32 %s700_s16, %s951_s5 }
  0x29   : > { %s173_s26 = scalar_lea.vmem [#allocation8], %s471_s11  ;;  %p82_p12 = scmp.eq.s32.totalorder %s79_s19, 0 }
  0x2a   : > { %s181_s27 = sshll.u32 %s173_s26, 4  ;;  %s180_s30 = scalar_lea.hbm %s930_s2, %s472_s18  ;;  %s182_s27 = int_to_ptr.vmem [resolvable:$true] %s181_s27 }
  0x2b   : > { %s836_s8 = scalar_select %p82_p12, %s692_s14, %s84_s20  }
  0x2c   : > { %s170_s9 = scalar_lea.sflag [#allocation3], %s169_s4  ;;  %p590_p9 = pneg %p804_p4 }
  0x2d   : > { %s601_s28 = scalar_lea.vmem %s182_s27, 48  ;;  %s708_s10 = smov [#allocation8]  }
  0x2e   : > { %p602_p8 = scmp.ne.s32.totalorder %s182_s27, %s601_s28  ;;  %s606_s0 = sshll.u32 %s708_s10, 4  ;;  %s607_s0 = int_to_ptr.vmem [resolvable:$false] %s606_s0 }
  0x2f   : > { %s608_s11 = scalar_lea.vmem %s607_s0, 96  ;;  %p609_p6 = scmp.lt.s32.totalorder %s182_s27, %s607_s0 }
  0x30   : > { %p604_p2 = pnand %p602_p8, %p590_p9  ;;  %p610_p10 = scmp.lt.s32.totalorder %s608_s11, %s601_s28 }
  0x32   : > { %p605_p5 = pneg %p604_p2  ;;  %p611_p11 = por %p610_p10, %p609_p6 }
  0x34   : > { %p612_p1 = pnand %p611_p11, %p605_p5 }
  0x36   : > { %615 = shalt.err (!%p612_p1)
}
  0x37   : > { %s709_s18 = smov 16   ;;  %s710_s20 = smov 1  }
  0x38   : > { %496 = dma.hbm_to_vmem [thread:$0]  (!%p804_p4), %s180_s30, 48, %s182_s27, %s170_s9, %s709_s18, %s709_s18, %s710_s20  }
  0x39   : > { %193 = sbr.rel (%p794_p13) target bundleno = 118 (0x76), region = 32 }
  0x3e   : > { %667 = dma.done.wait (%p773_p3), [#allocation5], 64  }
  0x3f   : > { %669 = vsyncadd (%p773_p3), [#allocation5], 4294967232 }
  0x40   : > { %671 = dma.done.wait (%p773_p3), [#allocation6], 16  }
  0x41   : > { %673 = vsyncadd (%p773_p3), [#allocation6], 4294967280  ;;  %s853_s0 = sand.u32 1, %s688_s13  }
  0x42   : > { %s473_s25 = smul.u32 3, %s853_s0  ;;  %s204_s29 = scalar_lea.sflag [#allocation3], %s853_s0 }
  0x44   : > { %s207_s4 = scalar_lea.vmem [#allocation8], %s473_s25 }
  0x45   : > { %675 = dma.done.wait (%p779_p7), %s204_s29, 48  }
  0x46   : > { %677 = vsyncadd (%p779_p7), %s204_s29, 4294967248 }
  0x47   : > { %212 = sfence }
  0x48   : > { %s236_s19 = sld [smem:[#allocation2]]  ;;  %v231_v0 = vld [vmem:[%s207_s4] sm:$0x1]  ;;  %v446_v1 = vld [vmem:[%s207_s4 + $0x1] sm:$0x1]  ;;  %s445_s25 = sshll.u32 %s853_s0, 2 }
  0x49   : > { %s448_s26 = sld [smem:[#allocation2 + $0x1]]  ;;  %v447_v2 = vld [vmem:[%s207_s4 + $0x2] sm:$0x1]  ;;  %v711_v27 = vmov -10.49165   ;;  %p942_p7 = scmp.ne.s32.totalorder %s936_s23, 0 }
  0x4a   : > { %s449_s27 = sld [smem:[#allocation2 + $0x2]] }
  0x4b   : > { %s861_s21 = sld [smem:[#allocation7]] }
  0x4c   : > { %s450_s6 = sld [smem:[#allocation2 + $0x80]] }
  0x4d   : > { %s451_s7 = sld [smem:[#allocation2 + $0x81]] }
  0x4e   : > { %v237_v3 = vstv %s236_s19  ;;  %s452_s30 = sld [smem:[#allocation2 + $0x82]]  ;;  %s230_s19 = scalar_lea.vmem [#allocation9], %s445_s25 }
  0x4f   : > { %v238_v4 = vmul.f32 %v237_v3, %v231_v0  ;;  %v240_v5 = vstv %s448_s26  ;;  %s863_s9 = sld [smem:[#allocation7 + $0x1]]  ;;  %s326_s26 = sshll.u32 %s230_s19, 4  ;;  %s875_s26 = int_to_ptr.vmem [resolvable:$true] %s326_s26 }
  0x50   : > { %v241_v6 = vmul.f32 %v446_v1, %v240_v5  ;;  %v244_v7 = vstv %s449_s27  ;;  %s455_s22 = sld [smem:[#allocation2 + $0x100]]  ;;  %s470_s27 = sshll.u32 %s696_s15, 6 }
  0x51   : > { %v245_v8 = vmul.f32 %v447_v2, %v244_v7  ;;  %s456_s28 = sld [smem:[#allocation2 + $0x101]]  ;;  %v248_v11 = vstv %s861_s21  ;;  %s712_s15 = smov [#allocation9]  }
  0x52   : > { %v242_v9 = vadd.f32 %v241_v6, %v238_v4  ;;  %v255_v10 = vstv %s450_s6  ;;  %s457_s10 = sld [smem:[#allocation2 + $0x102]] }
  0x53   : > { %v256_v12 = vmul.f32 %v255_v10, %v231_v0  ;;  %v258_v13 = vstv %s451_s7  ;;  %s866_s11 = sld [smem:[#allocation7 + $0x2]]  ;;  %s880_s7 = scalar_lea.hbm %s931_s3, %s470_s27 }
  0x54   : > { %v246_v14 = vadd.f32 %v245_v8, %v242_v9  ;;  %v259_v15 = vmul.f32 %v446_v1, %v258_v13  ;;  %v262_v16 = vstv %s452_s30  ;;  %s460_s18 = sld [smem:[#allocation2 + $0x180]]  ;;  %s312_s30 = scalar_lea.sflag [#allocation4], %s853_s0 }
  0x55   : > { %v263_v17 = vmul.f32 %v447_v2, %v262_v16  ;;  %s461_s20 = sld [smem:[#allocation2 + $0x181]]  ;;  %v266_v21 = vstv %s863_s9  ;;  %s616_s9 = scalar_lea.vmem %s875_s26, 64 }
  0x56   : > { %v249_v18 = vadd.f32 %v248_v11, %v246_v14  ;;  %v260_v19 = vadd.f32 %v259_v15, %v256_v12  ;;  %v274_v20 = vstv %s455_s22  ;;  %s462_s29 = sld [smem:[#allocation2 + $0x182]]  ;;  %p617_p3 = scmp.ne.s32.totalorder %s875_s26, %s616_s9 }
  0x57   : > { %v275_v22 = vmul.f32 %v274_v20, %v231_v0  ;;  %v277_v23 = vstv %s456_s28  ;;  %s870_s4 = sld [smem:[#allocation7 + $0x3]]  ;;  %s620_s22 = sshll.u32 %s712_s15, 4  ;;  %s621_s22 = int_to_ptr.vmem [resolvable:$false] %s620_s22 }
  0x58   : > { %vm250_vm0 = vcmp.gt.f32.partialorder %v249_v18, 0.0  ;;  %v264_v24 = vadd.f32 %v263_v17, %v260_v19  ;;  %v278_v25 = vmul.f32 %v446_v1, %v277_v23  ;;  %v281_v26 = vstv %s457_s10  ;;  %p618_p13 = pnand %p617_p3, %p942_p7  ;;  %s622_s28 = scalar_lea.vmem %s621_s22, 128 }
  0x59   : > { %v251_v28 = vsel %vm250_vm0, 1.0, %v711_v27  ;;  %v282_v29 = vmul.f32 %v447_v2, %v281_v26  ;;  %v285_v34 = vstv %s866_s11  ;;  %p623_p0 = scmp.lt.s32.totalorder %s875_s26, %s621_s22  ;;  %p624_p12 = scmp.lt.s32.totalorder %s622_s28, %s616_s9 }
  0x5a   : > { %v252_v30 = vmul.f32 %v251_v28, %v249_v18  ;;  %v267_v31 = vadd.f32 %v266_v21, %v264_v24  ;;  %v279_v32 = vadd.f32 %v278_v25, %v275_v22  ;;  %v293_v33 = vstv %s460_s18  ;;  %p619_p4 = pneg %p618_p13 }
  0x5b   : > { %v294_v35 = vmul.f32 %v293_v33, %v231_v0  ;;  %v296_v36 = vstv %s461_s20  ;;  %p625_p9 = por %p624_p12, %p623_p0 }
  0x5c   : > { %253 = vst [vmem:[%s230_s19] sm:$0x1] %v252_v30  ;;  %vm268_vm1 = vcmp.gt.f32.partialorder %v267_v31, 0.0  ;;  %v283_v37 = vadd.f32 %v282_v29, %v279_v32  ;;  %v297_v38 = vmul.f32 %v446_v1, %v296_v36  ;;  %v300_v39 = vstv %s462_s29 }
  0x5d   : > { %v269_v40 = vsel %vm268_vm1, 1.0, %v711_v27  ;;  %v301_v41 = vmul.f32 %v447_v2, %v300_v39  ;;  %v304_v45 = vstv %s870_s4  ;;  %p626_p8 = pnand %p625_p9, %p619_p4 }
  0x5e   : > { %v270_v42 = vmul.f32 %v269_v40, %v267_v31  ;;  %v286_v43 = vadd.f32 %v285_v34, %v283_v37  ;;  %v298_v44 = vadd.f32 %v297_v38, %v294_v35 }
  0x60   : > { %454 = vst [vmem:[%s230_s19 + $0x1] sm:$0x1] %v270_v42  ;;  %vm287_vm2 = vcmp.gt.f32.partialorder %v286_v43, 0.0  ;;  %v302_v46 = vadd.f32 %v301_v41, %v298_v44 }
  0x61   : > { %v288_v47 = vsel %vm287_vm2, 1.0, %v711_v27 }
  0x62   : > { %v289_v48 = vmul.f32 %v288_v47, %v286_v43  ;;  %v305_v49 = vadd.f32 %v304_v45, %v302_v46 }
  0x64   : > { %459 = vst [vmem:[%s230_s19 + $0x2] sm:$0x1] %v289_v48  ;;  %vm306_vm3 = vcmp.gt.f32.partialorder %v305_v49, 0.0 }
  0x65   : > { %v307_v50 = vsel %vm306_vm3, 1.0, %v711_v27 }
  0x66   : > { %v308_v51 = vmul.f32 %v307_v50, %v305_v49 }
  0x68   : > { %464 = vst [vmem:[%s230_s19 + $0x3] sm:$0x1] %v308_v51 }
  0x69   : > { %629 = shalt.err (!%p626_p8)
}
  0x6a   : > { %s630_s10 = scalar_lea.hbm %s880_s7, 64  ;;  %s634_s20 = scalar_lea.hbm %s931_s3, 128 }
  0x6b   : > { %p631_p2 = scmp.ne.s32.totalorder %s880_s7, %s630_s10  ;;  %p635_p10 = scmp.lt.s32.totalorder %s880_s7, %s931_s3 }
  0x6c   : > { %p636_p11 = scmp.lt.s32.totalorder %s634_s20, %s630_s10 }
  0x6d   : > { %p632_p5 = pnand %p631_p2, %p942_p7 }
  0x6e   : > { %p637_p1 = por %p636_p11, %p635_p10 }
  0x6f   : > { %p633_p6 = pneg %p632_p5 }
  0x71   : > { %p638_p3 = pnand %p637_p1, %p633_p6 }
  0x73   : > { %641 = shalt.err (!%p638_p3)
}
  0x74   : > { %s713_s4 = smov 16   ;;  %s714_s19 = smov 1  }
  0x75   : > { %484 = dma.vmem_to_hbm [thread:$0]  (%p942_p7), %s875_s26, 64, %s880_s7, %s312_s30, %s713_s4, %s713_s4, %s714_s19  }
  0x76 PF: > { %s341_s27 = sand.u32 1, %s684_s12   ;;  %p943_p13 = scmp.ne.s32.totalorder %s937_s24, 0 }
  0x77   : > { %p944_p4 = scmp.ge.s32.totalorder %s704_s17, 2  ;;  %s342_s21 = scalar_lea.sflag [#allocation4], %s341_s27 }
  0x79   : > { %p498_p0 = pnand %p944_p4, %p943_p13 }
  0x7b   : > { %p499_p12 = pneg %p498_p0 }
  0x7d   : > { %679 = dma.done.wait (%p499_p12), %s342_s21, 64  }
  0x7e   : > { %681 = vsyncadd (%p499_p12), %s342_s21, 4294967232  ;;  %s21_s17 = sadd.s32 1, %s704_s17   ;;  %s945_s12 = smov %s688_s13 }
  0x7f   : > { %p18_p9 = scmp.ge.s32.totalorder %s21_s17, 4   ;;  %s946_s13 = smov %s692_s14 }
  0x80   : > { %s947_s14 = smov %s836_s8  ;;  %s948_s15 = smov %s700_s16 }
  0x81   : > { %s949_s16 = smov %s951_s5  ;;  %20 = sbr.rel (!%p18_p9) target bundleno = 10 (0xa), region = 92 }
  0x86   :  { %347 = vsyncpa [#allocation3], 1 }
  0x87   :  { %349 = vsyncpa [#allocation3 + $0x1], 1 }
  0x88   :  { %350 = vsyncpa [#allocation4], 1 }
  0x89   :  { %352 = vsyncpa [#allocation4 + $0x1], 1 }
  0x8a   :  { %353 = vsyncpa [#allocation5], 1 }
  0x8b   :  { %355 = vsyncpa [#allocation5 + $0x1], 1 }
  0x8c   :  { %356 = vsyncpa [#allocation6], 1 }
  0x8d   :  { %358 = vsyncpa [#allocation6 + $0x1], 1 }

</bundles_post_ra>
